<compile_context>
chip_gen: v6e
topology: v6e:2x2x1
jax: 0.10.0
libtpu: 0.0.40
codegen_flags: <defaults>
</compile_context>

<pallas_src>
import functools
import math

import jax
import jax.numpy as jnp
from jax.experimental import pallas as pl
from jax.experimental.pallas import tpu as pltpu


def _round_up(n, m):
    return ((n + m - 1) // m) * m


def _global_avg_kernel(x_ref, o_ref, acc_ref, *, inv_hw, lane_chunks):
    # x_ref:   (TM, TK) input tile, native dtype
    # o_ref:   (TM, 1) per-row means for this row tile (written on last k only)
    # acc_ref: (TM, 128) f32 accumulator, persists across the reduction axis
    k = pl.program_id(1)

    @pl.when(k == 0)
    def _init():
        acc_ref[...] = jnp.zeros_like(acc_ref)

    # Chunked VPU accumulation: fold the TK lanes of this block into the 128-lane
    # accumulator with elementwise adds on static 128-aligned lane slices.
    for j in range(lane_chunks):
        acc_ref[...] += x_ref[:, j * 128:(j + 1) * 128].astype(jnp.float32)

    @pl.when(k == pl.num_programs(1) - 1)
    def _finalize():
        # One cross-lane reduce per row tile, then scale by 1/HW.
        s = jnp.sum(acc_ref[...], axis=-1, keepdims=True)  # (TM, 1) f32
        o_ref[...] = (s * jnp.float32(inv_hw)).astype(o_ref.dtype)


def global_avg(x, filters_size=None, *, max_block_rows=1024, max_block_cols=2048):
    """x: (B, C, H, W) -> (B, filters_size, 1, 1), mean over the flattened tail."""
    B = x.shape[0]
    if filters_size is None:
        filters_size = x.shape[1]
    total = math.prod(x.shape[1:])
    assert total % filters_size == 0, "filters_size must divide prod(x.shape[1:])"
    HW = total // filters_size
    R = B * filters_size

    x2 = x.reshape(R, HW)

    # Tile sizes: rows multiple of 8, cols multiple of 128, sized for VMEM
    # (2 buffers x TM*TK*dtype_bytes stays well under the 32 MiB scoped budget).
    TM = min(max_block_rows, _round_up(R, 8))
    TK = min(max_block_cols, _round_up(HW, 128))

    Rp = _round_up(R, TM)
    HWp = _round_up(HW, TK)
    if (Rp, HWp) != (R, HW):
        # Zero padding leaves the row sums unchanged; we divide by the true HW.
        x2 = jnp.pad(x2, ((0, Rp - R), (0, HWp - HW)))

    grid = (Rp // TM, HWp // TK)

    kernel = functools.partial(
        _global_avg_kernel, inv_hw=1.0 / HW, lane_chunks=TK // 128
    )

    out = pl.pallas_call(
        kernel,
        out_shape=jax.ShapeDtypeStruct((Rp, 1), x.dtype),
        grid_spec=pltpu.PrefetchScalarGridSpec(
            num_scalar_prefetch=0,
            grid=grid,
            in_specs=[pl.BlockSpec((TM, TK), lambda i, k: (i, k))],
            out_specs=pl.BlockSpec((TM, 1), lambda i, k: (i, 0)),
            scratch_shapes=[pltpu.VMEM((TM, 128), jnp.float32)],
        ),
        compiler_params=pltpu.CompilerParams(
            dimension_semantics=("parallel", "arbitrary"),
            vmem_limit_bytes=32 * 1024 * 1024,
        ),
    )(x2)

    return out[:R, 0].reshape(B, filters_size, 1, 1)


def _reference(x, filters_size=None):
    B = x.shape[0]
    if filters_size is None:
        filters_size = x.shape[1]
    return jnp.mean(x.reshape(B, filters_size, -1), axis=2).reshape(
        B, filters_size, 1, 1
    )


if __name__ == "__main__":
    key = jax.random.PRNGKey(0)

    # Main case (matches the module spec: batch=2, filters_size=4, spatial=16x16).
    B, C, H, W = 2, 4, 16, 16
    x = jax.random.normal(key, (B, C, H, W), dtype=jnp.float32)
    y = global_avg(x)
    jax.block_until_ready(y)
    y_ref = _reference(x)
    assert y.shape == (B, C, 1, 1)
    assert jnp.allclose(y, y_ref, atol=1e-5, rtol=1e-5)

    # Multi-tile case: exercises multiple row tiles and the HW reduction axis.
    k2 = jax.random.PRNGKey(1)
    x2 = jax.random.normal(k2, (2, 16, 16, 16), dtype=jnp.float32)
    y2 = global_avg(x2, max_block_rows=8, max_block_cols=128)
    jax.block_until_ready(y2)
    assert jnp.allclose(y2, _reference(x2), atol=1e-5, rtol=1e-5)

    # Ragged case: exercises row/col zero-padding paths.
    k3 = jax.random.PRNGKey(2)
    x3 = jax.random.normal(k3, (2, 7, 9, 13), dtype=jnp.float32)
    y3 = global_avg(x3)
    jax.block_until_ready(y3)
    assert jnp.allclose(y3, _reference(x3), atol=1e-5, rtol=1e-5)

    print("KERNEL_OK")
</pallas_src>

<mosaic_0001>
module attributes {stable_mosaic.version = 11 : i64} {
  func.func @_global_avg_kernel(%arg0: i32, %arg1: i32, %arg2: memref<8x256xf32, #tpu.memory_space<vmem>>, %arg3: memref<8x1xf32, #tpu.memory_space<vmem>>, %arg4: memref<8x128xf32, #tpu.memory_space<vmem>>) attributes {dimension_semantics = [#tpu.dimension_semantics<parallel>, #tpu.dimension_semantics<arbitrary>], iteration_bounds = array<i64: 1, 1>, scalar_prefetch = 0 : i64, scratch_operands = 1 : i64, tpu.core_type = #tpu.core_type<tc>, window_params = [{transform_indices = @transform_0, window_bounds = array<i64: 8, 256>}, {transform_indices = @transform_1, window_bounds = array<i64: 8, 1>}]} {
    %c0_i32 = arith.constant 0 : i32
    %0 = arith.cmpi eq, %arg1, %c0_i32 : i32
    %1 = arith.extui %0 : i1 to i32
    %c0_i32_0 = arith.constant 0 : i32
    %2 = arith.cmpi ne, %1, %c0_i32_0 : i32
    scf.if %2 {
      %cst = arith.constant 0.000000e+00 : f32
      %14 = vector.broadcast %cst : f32 to vector<8x128xf32>
      %c0_13 = arith.constant 0 : index
      %c0_14 = arith.constant 0 : index
      %15 = vector.load %arg4[%c0_13, %c0_14] : memref<8x128xf32, #tpu.memory_space<vmem>>, vector<8x128xf32>
      tpu.vector_store %arg4[%c0_13, %c0_14], %14 {strides = array<i32>} : memref<8x128xf32, #tpu.memory_space<vmem>>, vector<8x128xf32>,
    } else {
    }
    %c0 = arith.constant 0 : index
    %c0_1 = arith.constant 0 : index
    %3 = vector.load %arg4[%c0, %c0_1] : memref<8x128xf32, #tpu.memory_space<vmem>>, vector<8x128xf32>
    %c0_2 = arith.constant 0 : index
    %c0_3 = arith.constant 0 : index
    %4 = vector.load %arg2[%c0_2, %c0_3] : memref<8x256xf32, #tpu.memory_space<vmem>>, vector<8x128xf32>
    %5 = arith.addf %3, %4 : vector<8x128xf32>
    %c0_4 = arith.constant 0 : index
    %c0_5 = arith.constant 0 : index
    %6 = vector.load %arg4[%c0_4, %c0_5] : memref<8x128xf32, #tpu.memory_space<vmem>>, vector<8x128xf32>
    tpu.vector_store %arg4[%c0_4, %c0_5], %5 {strides = array<i32>} : memref<8x128xf32, #tpu.memory_space<vmem>>, vector<8x128xf32>,
    %c0_6 = arith.constant 0 : index
    %c0_7 = arith.constant 0 : index
    %7 = vector.load %arg4[%c0_6, %c0_7] : memref<8x128xf32, #tpu.memory_space<vmem>>, vector<8x128xf32>
    %c0_8 = arith.constant 0 : index
    %c128 = arith.constant 128 : index
    %8 = vector.load %arg2[%c0_8, %c128] : memref<8x256xf32, #tpu.memory_space<vmem>>, vector<8x128xf32>
    %9 = arith.addf %7, %8 : vector<8x128xf32>
    %c0_9 = arith.constant 0 : index
    %c0_10 = arith.constant 0 : index
    %10 = vector.load %arg4[%c0_9, %c0_10] : memref<8x128xf32, #tpu.memory_space<vmem>>, vector<8x128xf32>
    tpu.vector_store %arg4[%c0_9, %c0_10], %9 {strides = array<i32>} : memref<8x128xf32, #tpu.memory_space<vmem>>, vector<8x128xf32>,
    %c0_i32_11 = arith.constant 0 : i32
    %11 = arith.cmpi eq, %arg1, %c0_i32_11 : i32
    %12 = arith.extui %11 : i1 to i32
    %c0_i32_12 = arith.constant 0 : i32
    %13 = arith.cmpi ne, %12, %c0_i32_12 : i32
    scf.if %13 {
      %c0_13 = arith.constant 0 : index
      %c0_14 = arith.constant 0 : index
      %14 = vector.load %arg4[%c0_13, %c0_14] : memref<8x128xf32, #tpu.memory_space<vmem>>, vector<8x128xf32>
      %cst = arith.constant dense<0.000000e+00> : vector<8xf32>
      %15 = vector.multi_reduction <add>, %14, %cst [1] : vector<8x128xf32> to vector<8xf32>
      %16 = vector.shape_cast %15 : vector<8xf32> to vector<8x1xf32>
      %cst_15 = arith.constant 3.906250e-03 : f32
      %17 = vector.broadcast %cst_15 : f32 to vector<8x1xf32>
      %18 = arith.mulf %16, %17 : vector<8x1xf32>
      %c0_16 = arith.constant 0 : index
      %c0_17 = arith.constant 0 : index
      %19 = vector.load %arg3[%c0_16, %c0_17] : memref<8x1xf32, #tpu.memory_space<vmem>>, vector<8x1xf32>
      tpu.vector_store %arg3[%c0_16, %c0_17], %18 {strides = array<i32>} : memref<8x1xf32, #tpu.memory_space<vmem>>, vector<8x1xf32>,
    } else {
    }
    return
  }
  func.func @transform_0(%arg0: i32, %arg1: i32) -> (i32, i32) {
    %c0_i32 = arith.constant 0 : i32
    return %arg0, %arg1 : i32, i32
  }
  func.func @transform_1(%arg0: i32, %arg1: i32) -> (i32, i32) {
    %c0_i32 = arith.constant 0 : i32
    %c0_i32_0 = arith.constant 0 : i32
    return %arg0, %c0_i32 : i32, i32
  }
}

</mosaic_0001>

<bundles_post_ra>
// kernel: tpu_custom_call.1
= control target key start
LH: loop header
LB: loop body
LE: loop exit
PB: predicated region body
PF: predicated region fallthrough
CT: control target
= control target key end

     0   :  { %6 = vsyncpa [#allocation4], 0  ;;  %s70_s6 = smov [#allocation3]   ;;  %s87_s0 = inlined_call_operand.hbm [shape: f32[8,256], index: 0, kind: input, shape index: {}]   ;;  %s88_s1 = inlined_call_operand.vmem [shape: f32[8,1], index: 1, kind: output, shape index: {}]  }
   0x1   :  { %s13_s7 = sshll.u32 %s70_s6, 4  ;;  %s14_s7 = int_to_ptr.vmem [resolvable:$true] %s13_s7 }
   0x2   :  { %s56_s8 = scalar_lea.vmem %s14_s7, 256  ;;  %p61_p1 = scmp.lt.s32.totalorder %s14_s7, %s14_s7 }
   0x3   :  { %p57_p0 = scmp.ne.s32.totalorder %s14_s7, %s56_s8  ;;  %p62_p2 = scmp.lt.s32.totalorder %s56_s8, %s56_s8 }
   0x5   :  { %p63_p3 = por %p62_p2, %p61_p1 }
   0x7   :  { %p64_p4 = pnand %p63_p3, %p57_p0 }
   0x9   :  { %67 = shalt.err (!%p64_p4)
}
   0xa   :  { %16 = dma.hbm_to_vmem [thread:$0]  %s87_s0, 256, %s14_s7, [#allocation4]  }
   0xb   :  { %68 = dma.done.wait [#allocation4], 256  }
   0xc   :  { %69 = vsyncadd [#allocation4], 4294967040  ;;  %v26_v0 = vld [vmem:[#allocation3] sm:$0xff]  ;;  %v30_v1 = vld [vmem:[#allocation3 + $0x8] sm:$0xff]  ;;  %vm40_vm0 = vcmask 7168  }
   0xd   :  { %v31_v2 = vadd.f32 %v30_v1, %v26_v0 }
   0xf   :  { %37 = vadd.xlane.f32.xlu0 %v31_v2 }
  0x98   :  { %v38_v3 = vpop.xlane.xlu0 %37 }
  0x99   :  { %v39_v4 = vmul.f32 0.00390625, %v38_v3 }
  0x9b   :  { %41 = vst.msk [vmem:[%s88_s1] sm:$0xff] %vm40_vm0, %v39_v4 }
  0x9c   :  { %46 = vsyncpa [#allocation4], 1 }

</bundles_post_ra>
